<compile_context>
chip_gen: v6e
topology: v6e:2x2x1
jax: 0.10.0
libtpu: 0.0.40
codegen_flags: <defaults>
</compile_context>

<pallas_src>
import functools

import jax
import jax.numpy as jnp
from jax import lax
from jax.experimental import pallas as pl
from jax.experimental.pallas import tpu as pltpu


def _block_kernel(x_ref, bw1_ref, bw2_ref, pwres_ref, b1_ref, b2_ref,
                  bres_ref, mask_ref, phm_ref, phr_ref, pwo_ref,
                  out_ref, h1pad_ref, *, bt, Hp, WCout):
    # R = conv-output rows of this batch tile (includes junk rows that straddle
    # image boundaries; those are zeroed by `mask` so they double as the zero
    # row-padding of the second conv).
    R = bt * Hp - 2

    # ---- conv1 (3x3, pad=1) + bias + ReLU: 3 banded matmuls ----
    acc = jnp.dot(x_ref[0:R, :], bw1_ref[0], preferred_element_type=jnp.float32)
    acc = acc + jnp.dot(x_ref[1:1 + R, :], bw1_ref[1],
                        preferred_element_type=jnp.float32)
    acc = acc + jnp.dot(x_ref[2:2 + R, :], bw1_ref[2],
                        preferred_element_type=jnp.float32)
    h1 = jnp.maximum(acc + b1_ref[...], 0.0) * mask_ref[...]

    # ---- write h1 into the row-padded scratch slab ----
    # Only the outermost two pad rows need explicit zeroing; the inter-image
    # pad rows are written with the masked zeros above every step, so this is
    # correct under "parallel" (per-core scratch) and avoids a full-slab fill.
    zrow = jnp.zeros((1, WCout), h1pad_ref.dtype)
    h1pad_ref[0:1, :] = zrow
    h1pad_ref[bt * Hp - 1:bt * Hp, :] = zrow
    h1pad_ref[1:1 + R, :] = h1.astype(h1pad_ref.dtype)

    # ---- conv2 (3x3, pad=1) + bias + ReLU: 3 banded matmuls ----
    acc2 = jnp.dot(h1pad_ref[0:R, :], bw2_ref[0],
                   preferred_element_type=jnp.float32)
    acc2 = acc2 + jnp.dot(h1pad_ref[1:1 + R, :], bw2_ref[1],
                          preferred_element_type=jnp.float32)
    acc2 = acc2 + jnp.dot(h1pad_ref[2:2 + R, :], bw2_ref[2],
                          preferred_element_type=jnp.float32)
    h2 = jnp.maximum(acc2 + b2_ref[...], 0.0).astype(jnp.bfloat16)

    # ---- main path: 2x2 average pool (row pool also compacts out junk rows) ----
    rowpool = jnp.dot(phm_ref[...], h2, preferred_element_type=jnp.float32)
    pooled_main = jnp.dot(rowpool.astype(jnp.bfloat16), pwo_ref[...],
                          preferred_element_type=jnp.float32)

    # ---- residual path: 2x2 average pool + 1x1 conv, fused into 2 matmuls ----
    rowpool_x = jnp.dot(phr_ref[...], x_ref[...],
                        preferred_element_type=jnp.float32)
    res = jnp.dot(rowpool_x.astype(jnp.bfloat16), pwres_ref[...],
                  preferred_element_type=jnp.float32)

    out_ref[...] = (pooled_main + res + bres_ref[...]).astype(out_ref.dtype)


def _pick_batch_tile(N, Hp):
    """Largest divisor of N keeping the stacked slab near/below ~128 rows."""
    target = max(1, -(-128 // Hp))
    bt = 1
    for d in range(1, N + 1):
        if N % d == 0 and d <= target:
            bt = d
    return bt


def prepare_block_params(params, *, N, H, W):
    """One-time preprocessing (hoisted out of the per-call forward):
    banded conv weights, pooling matrices, tiled biases, boundary mask."""
    Cout, Cin = params["w1"].shape[:2]
    Hp, H2, W2 = H + 2, H // 2, W // 2
    bt = _pick_batch_tile(N, Hp)
    f32, bf16 = jnp.float32, jnp.bfloat16

    def banded(w):                                   # w: (Co, Ci, 3, 3)
        co, ci = w.shape[0], w.shape[1]
        taps = jnp.transpose(w, (2, 3, 1, 0)).astype(f32)   # (kh, kw, ci, co)
        wi = jnp.arange(W)
        mats = []
        for kh in range(3):
            m = jnp.zeros((W * ci, W * co), f32)
            for kw in range(3):
                # sel[w_in, w_out] = 1 iff w_in == w_out + kw - 1 (pad=1 built in)
                sel = (wi[:, None] == wi[None, :] + (kw - 1)).astype(f32)
                m = m + jnp.kron(sel, taps[kh, kw])
            mats.append(m)
        return jnp.stack(mats).astype(bf16)          # (3, W*ci, W*co)

    bw1 = banded(params["w1"])
    bw2 = banded(params["w2"])

    # 2x2 average pooling expressed as matmuls.
    pw = 0.5 * (jnp.arange(W)[:, None] // 2 ==
                jnp.arange(W2)[None, :]).astype(f32)               # (W, W2)
    pwo = jnp.kron(pw, jnp.eye(Cout, dtype=f32)).astype(bf16)      # (W*Cout, W2*Cout)
    wres_t = params["wres"][:, :, 0, 0].T.astype(f32)              # (Cin, Cout)
    pwres = jnp.kron(pw, wres_t).astype(bf16)                      # (W*Cin, W2*Cout)

    ro = jnp.arange(bt * H2)
    b_i, ho = ro // H2, ro % H2
    cm = jnp.arange(bt * Hp - 2)[None, :]
    phm = 0.5 * ((cm == (b_i * Hp + 2 * ho)[:, None]) |
                 (cm == (b_i * Hp + 2 * ho + 1)[:, None])).astype(f32)
    cr = jnp.arange(bt * Hp)[None, :]
    phr = 0.5 * ((cr == (b_i * Hp + 1 + 2 * ho)[:, None]) |
                 (cr == (b_i * Hp + 2 + 2 * ho)[:, None])).astype(f32)

    rr = jnp.arange(bt * Hp - 2)
    mask = ((rr % Hp) < H).astype(f32)[:, None]                    # (R, 1)

    return dict(
        bw1=bw1, bw2=bw2, pwres=pwres, pwo=pwo,
        phm=phm.astype(bf16), phr=phr.astype(bf16), mask=mask,
        b1=jnp.tile(params["b1"].astype(f32), W)[None, :],
        b2=jnp.tile(params["b2"].astype(f32), W)[None, :],
        bres=jnp.tile(params["bres"].astype(f32), W2)[None, :],
        meta=dict(N=N, H=H, W=W, Cin=Cin, Cout=Cout, bt=bt),
    )


def discriminator_sn_block(x_nchw, prep):
    m = prep["meta"]
    N, H, W, Cin, Cout, bt = m["N"], m["H"], m["W"], m["Cin"], m["Cout"], m["bt"]
    Hp, H2, W2 = H + 2, H // 2, W // 2
    R = bt * Hp - 2

    # NCHW -> row-stacked channels-last slab (N*Hp, W*Cin).  Only height is
    # zero-padded here; width padding lives inside the banded weights.
    x = jnp.transpose(x_nchw, (0, 2, 3, 1)).reshape(N, H, W * Cin)
    x = jnp.pad(x, ((0, 0), (1, 1), (0, 0)))
    x_slab = x.reshape(N * Hp, W * Cin).astype(jnp.bfloat16)

    kernel = functools.partial(_block_kernel, bt=bt, Hp=Hp, WCout=W * Cout)

    out2d = pl.pallas_call(
        kernel,
        out_shape=jax.ShapeDtypeStruct((N * H2, W2 * Cout), jnp.float32),
        grid_spec=pltpu.PrefetchScalarGridSpec(
            num_scalar_prefetch=0,
            grid=(N // bt,),
            in_specs=[
                pl.BlockSpec((bt * Hp, W * Cin), lambda i: (i, 0)),
                pl.BlockSpec((3, W * Cin, W * Cout), lambda i: (0, 0, 0)),
                pl.BlockSpec((3, W * Cout, W * Cout), lambda i: (0, 0, 0)),
                pl.BlockSpec((W * Cin, W2 * Cout), lambda i: (0, 0)),
                pl.BlockSpec((1, W * Cout), lambda i: (0, 0)),
                pl.BlockSpec((1, W * Cout), lambda i: (0, 0)),
                pl.BlockSpec((1, W2 * Cout), lambda i: (0, 0)),
                pl.BlockSpec((R, 1), lambda i: (0, 0)),
                pl.BlockSpec((bt * H2, R), lambda i: (0, 0)),
                pl.BlockSpec((bt * H2, bt * Hp), lambda i: (0, 0)),
                pl.BlockSpec((W * Cout, W2 * Cout), lambda i: (0, 0)),
            ],
            out_specs=pl.BlockSpec((bt * H2, W2 * Cout), lambda i: (i, 0)),
            scratch_shapes=[pltpu.VMEM((bt * Hp, W * Cout), jnp.bfloat16)],
        ),
        compiler_params=pltpu.CompilerParams(
            dimension_semantics=("parallel",),     # batch tiles are independent
            vmem_limit_bytes=32 * 1024 * 1024),
    )(x_slab, prep["bw1"], prep["bw2"], prep["pwres"], prep["b1"], prep["b2"],
      prep["bres"], prep["mask"], prep["phm"], prep["phr"], prep["pwo"])

    out = out2d.reshape(N, H2, W2, Cout)
    return jnp.transpose(out, (0, 3, 1, 2))                         # NCHW


# ---------------- glue: deterministic params & pure-JAX reference ------------
# TODO(synk): spectral_norm's per-forward power iteration with persistent u/v
# buffers is parameter preprocessing; done here in plain JAX, not in the kernel.
def _spectral_normalize(w, key, n_iter=8):
    out_c = w.shape[0]
    w_mat = w.reshape(out_c, -1)
    u = jax.random.normal(key, (out_c,), dtype=w.dtype)
    u = u / (jnp.linalg.norm(u) + 1e-12)
    v = w_mat.T @ u
    for _ in range(n_iter):
        v = w_mat.T @ u
        v = v / (jnp.linalg.norm(v) + 1e-12)
        u = w_mat @ v
        u = u / (jnp.linalg.norm(u) + 1e-12)
    sigma = u @ (w_mat @ v)
    return w / sigma


def _avg_pool2(x_nchw):
    n, c, h, w = x_nchw.shape
    return x_nchw.reshape(n, c, h // 2, 2, w // 2, 2).mean(axis=(3, 5))


def reference_forward(x_nchw, p):
    dn = ("NCHW", "OIHW", "NCHW")
    h = lax.conv_general_dilated(x_nchw, p["w1"], (1, 1), ((1, 1), (1, 1)),
                                 dimension_numbers=dn)
    h = jax.nn.relu(h + p["b1"][None, :, None, None])
    h = lax.conv_general_dilated(h, p["w2"], (1, 1), ((1, 1), (1, 1)),
                                 dimension_numbers=dn)
    h = jax.nn.relu(h + p["b2"][None, :, None, None])
    h = _avg_pool2(h)
    idn = _avg_pool2(x_nchw)
    r = lax.conv_general_dilated(idn, p["wres"], (1, 1), ((0, 0), (0, 0)),
                                 dimension_numbers=dn)
    r = r + p["bres"][None, :, None, None]
    return h + r


if __name__ == "__main__":
    key = jax.random.PRNGKey(0)
    kx, k1, k2, k3, kb1, kb2, kb3, ku1, ku2, ku3 = jax.random.split(key, 10)

    N, Cin, Cout, H, W = 2, 4, 8, 16, 16

    w1 = 0.1 * jax.random.normal(k1, (Cout, Cin, 3, 3), dtype=jnp.float32)
    w2 = 0.1 * jax.random.normal(k2, (Cout, Cout, 3, 3), dtype=jnp.float32)
    wres = 0.1 * jax.random.normal(k3, (Cout, Cin, 1, 1), dtype=jnp.float32)
    params = {
        "w1": _spectral_normalize(w1, ku1),
        "w2": _spectral_normalize(w2, ku2),
        "wres": _spectral_normalize(wres, ku3),
        "b1": 0.1 * jax.random.normal(kb1, (Cout,), dtype=jnp.float32),
        "b2": 0.1 * jax.random.normal(kb2, (Cout,), dtype=jnp.float32),
        "bres": 0.1 * jax.random.normal(kb3, (Cout,), dtype=jnp.float32),
    }

    x = jax.random.normal(kx, (N, Cin, H, W), dtype=jnp.float32)

    # One-time parameter preprocessing (hoisted), then a jitted forward that
    # closes over the prepared constants.
    prep = prepare_block_params(params, N=N, H=H, W=W)
    fwd = jax.jit(lambda inp: discriminator_sn_block(inp, prep))

    out = jax.block_until_ready(fwd(x))
    ref = jax.block_until_ready(reference_forward(x, params))

    assert out.shape == (N, Cout, H // 2, W // 2), out.shape
    max_err = float(jnp.max(jnp.abs(out - ref)))
    # bf16 MXU operands (f32 accumulation) vs. the f32 reference: slightly
    # looser tolerance than the pure-f32 path.
    assert bool(jnp.allclose(out, ref, atol=2e-2, rtol=2e-2)), max_err
    print("KERNEL_OK")
</pallas_src>

<mosaic_0001>
module attributes {stable_mosaic.version = 11 : i64} {
  func.func @_block_kernel(%arg0: i32, %arg1: memref<36x64xbf16, #tpu.memory_space<vmem>>, %arg2: memref<3x64x128xbf16, #tpu.memory_space<vmem>>, %arg3: memref<3x128x128xbf16, #tpu.memory_space<vmem>>, %arg4: memref<64x64xbf16, #tpu.memory_space<vmem>>, %arg5: memref<1x128xf32, #tpu.memory_space<vmem>>, %arg6: memref<1x128xf32, #tpu.memory_space<vmem>>, %arg7: memref<1x64xf32, #tpu.memory_space<vmem>>, %arg8: memref<34x1xf32, #tpu.memory_space<vmem>>, %arg9: memref<16x34xbf16, #tpu.memory_space<vmem>>, %arg10: memref<16x36xbf16, #tpu.memory_space<vmem>>, %arg11: memref<128x64xbf16, #tpu.memory_space<vmem>>, %arg12: memref<16x64xf32, #tpu.memory_space<vmem>>, %arg13: memref<36x128xbf16, #tpu.memory_space<vmem>>) attributes {dimension_semantics = [#tpu.dimension_semantics<parallel>], iteration_bounds = array<i64: 1>, scalar_prefetch = 0 : i64, scratch_operands = 1 : i64, tpu.core_type = #tpu.core_type<tc>, window_params = [{transform_indices = @transform_0, window_bounds = array<i64: 36, 64>}, {pipeline_mode = #tpu.pipeline_mode<synchronous>, transform_indices = @transform_1, window_bounds = array<i64: 3, 64, 128>}, {pipeline_mode = #tpu.pipeline_mode<synchronous>, transform_indices = @transform_2, window_bounds = array<i64: 3, 128, 128>}, {pipeline_mode = #tpu.pipeline_mode<synchronous>, transform_indices = @transform_3, window_bounds = array<i64: 64, 64>}, {pipeline_mode = #tpu.pipeline_mode<synchronous>, transform_indices = @transform_4, window_bounds = array<i64: 1, 128>}, {pipeline_mode = #tpu.pipeline_mode<synchronous>, transform_indices = @transform_5, window_bounds = array<i64: 1, 128>}, {pipeline_mode = #tpu.pipeline_mode<synchronous>, transform_indices = @transform_6, window_bounds = array<i64: 1, 64>}, {pipeline_mode = #tpu.pipeline_mode<synchronous>, transform_indices = @transform_7, window_bounds = array<i64: 34, 1>}, {pipeline_mode = #tpu.pipeline_mode<synchronous>, transform_indices = @transform_8, window_bounds = array<i64: 16, 34>}, {pipeline_mode = #tpu.pipeline_mode<synchronous>, transform_indices = @transform_9, window_bounds = array<i64: 16, 36>}, {pipeline_mode = #tpu.pipeline_mode<synchronous>, transform_indices = @transform_10, window_bounds = array<i64: 128, 64>}, {transform_indices = @transform_11, window_bounds = array<i64: 16, 64>}]} {
    %c0 = arith.constant 0 : index
    %c0_0 = arith.constant 0 : index
    %0 = vector.load %arg1[%c0, %c0_0] : memref<36x64xbf16, #tpu.memory_space<vmem>>, vector<34x64xbf16>
    %c0_1 = arith.constant 0 : index
    %c0_2 = arith.constant 0 : index
    %c0_3 = arith.constant 0 : index
    %1 = vector.load %arg2[%c0_1, %c0_2, %c0_3] : memref<3x64x128xbf16, #tpu.memory_space<vmem>>, vector<1x64x128xbf16>
    %2 = vector.shape_cast %1 : vector<1x64x128xbf16> to vector<64x128xbf16>
    %cst = arith.constant dense<0.000000e+00> : vector<34x128xf32>
    %3 = tpu.matmul %0, %2, %cst {dimension_numbers = #tpu.dot_dimension_numbers<[1], [0], [0], [1], [0, 0, 1, 1], [], []>} : vector<34x64xbf16>, vector<64x128xbf16>, vector<34x128xf32> -> vector<34x128xf32>
    %c1 = arith.constant 1 : index
    %c0_4 = arith.constant 0 : index
    %4 = vector.load %arg1[%c1, %c0_4] : memref<36x64xbf16, #tpu.memory_space<vmem>>, vector<34x64xbf16>
    %c1_5 = arith.constant 1 : index
    %c0_6 = arith.constant 0 : index
    %c0_7 = arith.constant 0 : index
    %5 = vector.load %arg2[%c1_5, %c0_6, %c0_7] : memref<3x64x128xbf16, #tpu.memory_space<vmem>>, vector<1x64x128xbf16>
    %6 = vector.shape_cast %5 : vector<1x64x128xbf16> to vector<64x128xbf16>
    %cst_8 = arith.constant dense<0.000000e+00> : vector<34x128xf32>
    %7 = tpu.matmul %4, %6, %cst_8 {dimension_numbers = #tpu.dot_dimension_numbers<[1], [0], [0], [1], [0, 0, 1, 1], [], []>} : vector<34x64xbf16>, vector<64x128xbf16>, vector<34x128xf32> -> vector<34x128xf32>
    %8 = arith.addf %3, %7 : vector<34x128xf32>
    %c2 = arith.constant 2 : index
    %c0_9 = arith.constant 0 : index
    %9 = vector.load %arg1[%c2, %c0_9] : memref<36x64xbf16, #tpu.memory_space<vmem>>, vector<34x64xbf16>
    %c2_10 = arith.constant 2 : index
    %c0_11 = arith.constant 0 : index
    %c0_12 = arith.constant 0 : index
    %10 = vector.load %arg2[%c2_10, %c0_11, %c0_12] : memref<3x64x128xbf16, #tpu.memory_space<vmem>>, vector<1x64x128xbf16>
    %11 = vector.shape_cast %10 : vector<1x64x128xbf16> to vector<64x128xbf16>
    %cst_13 = arith.constant dense<0.000000e+00> : vector<34x128xf32>
    %12 = tpu.matmul %9, %11, %cst_13 {dimension_numbers = #tpu.dot_dimension_numbers<[1], [0], [0], [1], [0, 0, 1, 1], [], []>} : vector<34x64xbf16>, vector<64x128xbf16>, vector<34x128xf32> -> vector<34x128xf32>
    %13 = arith.addf %8, %12 : vector<34x128xf32>
    %c0_14 = arith.constant 0 : index
    %c0_15 = arith.constant 0 : index
    %14 = vector.load %arg5[%c0_14, %c0_15] : memref<1x128xf32, #tpu.memory_space<vmem>>, vector<1x128xf32>
    %15 = vector.broadcast %14 : vector<1x128xf32> to vector<34x128xf32>
    %16 = arith.addf %13, %15 : vector<34x128xf32>
    %cst_16 = arith.constant 0.000000e+00 : f32
    %17 = vector.broadcast %cst_16 : f32 to vector<34x128xf32>
    %18 = arith.maximumf %16, %17 : vector<34x128xf32>
    %c0_17 = arith.constant 0 : index
    %c0_18 = arith.constant 0 : index
    %19 = vector.load %arg8[%c0_17, %c0_18] : memref<34x1xf32, #tpu.memory_space<vmem>>, vector<34x1xf32>
    %20 = vector.broadcast %19 : vector<34x1xf32> to vector<34x128xf32>
    %21 = arith.mulf %18, %20 : vector<34x128xf32>
    %cst_19 = arith.constant 0.000000e+00 : bf16
    %22 = vector.broadcast %cst_19 : bf16 to vector<1x128xbf16>
    %c0_20 = arith.constant 0 : index
    %c0_21 = arith.constant 0 : index
    %23 = vector.load %arg13[%c0_20, %c0_21] : memref<36x128xbf16, #tpu.memory_space<vmem>>, vector<1x128xbf16>
    tpu.vector_store %arg13[%c0_20, %c0_21], %22 {strides = array<i32>} : memref<36x128xbf16, #tpu.memory_space<vmem>>, vector<1x128xbf16>,
    %c35 = arith.constant 35 : index
    %c0_22 = arith.constant 0 : index
    %24 = vector.load %arg13[%c35, %c0_22] : memref<36x128xbf16, #tpu.memory_space<vmem>>, vector<1x128xbf16>
    tpu.vector_store %arg13[%c35, %c0_22], %22 {strides = array<i32>} : memref<36x128xbf16, #tpu.memory_space<vmem>>, vector<1x128xbf16>,
    %25 = arith.truncf %21 : vector<34x128xf32> to vector<34x128xbf16>
    %c1_23 = arith.constant 1 : index
    %c0_24 = arith.constant 0 : index
    %26 = vector.load %arg13[%c1_23, %c0_24] : memref<36x128xbf16, #tpu.memory_space<vmem>>, vector<34x128xbf16>
    tpu.vector_store %arg13[%c1_23, %c0_24], %25 {strides = array<i32>} : memref<36x128xbf16, #tpu.memory_space<vmem>>, vector<34x128xbf16>,
    %c0_25 = arith.constant 0 : index
    %c0_26 = arith.constant 0 : index
    %27 = vector.load %arg13[%c0_25, %c0_26] : memref<36x128xbf16, #tpu.memory_space<vmem>>, vector<34x128xbf16>
    %c0_27 = arith.constant 0 : index
    %c0_28 = arith.constant 0 : index
    %c0_29 = arith.constant 0 : index
    %28 = vector.load %arg3[%c0_27, %c0_28, %c0_29] : memref<3x128x128xbf16, #tpu.memory_space<vmem>>, vector<1x128x128xbf16>
    %29 = vector.shape_cast %28 : vector<1x128x128xbf16> to vector<128x128xbf16>
    %cst_30 = arith.constant dense<0.000000e+00> : vector<34x128xf32>
    %30 = tpu.matmul %27, %29, %cst_30 {dimension_numbers = #tpu.dot_dimension_numbers<[1], [0], [0], [1], [0, 0, 1, 1], [], []>} : vector<34x128xbf16>, vector<128x128xbf16>, vector<34x128xf32> -> vector<34x128xf32>
    %c1_31 = arith.constant 1 : index
    %c0_32 = arith.constant 0 : index
    %31 = vector.load %arg13[%c1_31, %c0_32] : memref<36x128xbf16, #tpu.memory_space<vmem>>, vector<34x128xbf16>
    %c1_33 = arith.constant 1 : index
    %c0_34 = arith.constant 0 : index
    %c0_35 = arith.constant 0 : index
    %32 = vector.load %arg3[%c1_33, %c0_34, %c0_35] : memref<3x128x128xbf16, #tpu.memory_space<vmem>>, vector<1x128x128xbf16>
    %33 = vector.shape_cast %32 : vector<1x128x128xbf16> to vector<128x128xbf16>
    %cst_36 = arith.constant dense<0.000000e+00> : vector<34x128xf32>
    %34 = tpu.matmul %31, %33, %cst_36 {dimension_numbers = #tpu.dot_dimension_numbers<[1], [0], [0], [1], [0, 0, 1, 1], [], []>} : vector<34x128xbf16>, vector<128x128xbf16>, vector<34x128xf32> -> vector<34x128xf32>
    %35 = arith.addf %30, %34 : vector<34x128xf32>
    %c2_37 = arith.constant 2 : index
    %c0_38 = arith.constant 0 : index
    %36 = vector.load %arg13[%c2_37, %c0_38] : memref<36x128xbf16, #tpu.memory_space<vmem>>, vector<34x128xbf16>
    %c2_39 = arith.constant 2 : index
    %c0_40 = arith.constant 0 : index
    %c0_41 = arith.constant 0 : index
    %37 = vector.load %arg3[%c2_39, %c0_40, %c0_41] : memref<3x128x128xbf16, #tpu.memory_space<vmem>>, vector<1x128x128xbf16>
    %38 = vector.shape_cast %37 : vector<1x128x128xbf16> to vector<128x128xbf16>
    %cst_42 = arith.constant dense<0.000000e+00> : vector<34x128xf32>
    %39 = tpu.matmul %36, %38, %cst_42 {dimension_numbers = #tpu.dot_dimension_numbers<[1], [0], [0], [1], [0, 0, 1, 1], [], []>} : vector<34x128xbf16>, vector<128x128xbf16>, vector<34x128xf32> -> vector<34x128xf32>
    %40 = arith.addf %35, %39 : vector<34x128xf32>
    %c0_43 = arith.constant 0 : index
    %c0_44 = arith.constant 0 : index
    %41 = vector.load %arg6[%c0_43, %c0_44] : memref<1x128xf32, #tpu.memory_space<vmem>>, vector<1x128xf32>
    %42 = vector.broadcast %41 : vector<1x128xf32> to vector<34x128xf32>
    %43 = arith.addf %40, %42 : vector<34x128xf32>
    %cst_45 = arith.constant 0.000000e+00 : f32
    %44 = vector.broadcast %cst_45 : f32 to vector<34x128xf32>
    %45 = arith.maximumf %43, %44 : vector<34x128xf32>
    %46 = arith.truncf %45 : vector<34x128xf32> to vector<34x128xbf16>
    %c0_46 = arith.constant 0 : index
    %c0_47 = arith.constant 0 : index
    %47 = vector.load %arg9[%c0_46, %c0_47] : memref<16x34xbf16, #tpu.memory_space<vmem>>, vector<16x34xbf16>
    %cst_48 = arith.constant dense<0.000000e+00> : vector<16x128xf32>
    %48 = tpu.matmul %47, %46, %cst_48 {dimension_numbers = #tpu.dot_dimension_numbers<[1], [0], [0], [1], [0, 0, 1, 1], [], []>} : vector<16x34xbf16>, vector<34x128xbf16>, vector<16x128xf32> -> vector<16x128xf32>
    %49 = arith.truncf %48 : vector<16x128xf32> to vector<16x128xbf16>
    %c0_49 = arith.constant 0 : index
    %c0_50 = arith.constant 0 : index
    %50 = vector.load %arg11[%c0_49, %c0_50] : memref<128x64xbf16, #tpu.memory_space<vmem>>, vector<128x64xbf16>
    %cst_51 = arith.constant dense<0.000000e+00> : vector<16x64xf32>
    %51 = tpu.matmul %49, %50, %cst_51 {dimension_numbers = #tpu.dot_dimension_numbers<[1], [0], [0], [1], [0, 0, 1, 1], [], []>} : vector<16x128xbf16>, vector<128x64xbf16>, vector<16x64xf32> -> vector<16x64xf32>
    %c0_52 = arith.constant 0 : index
    %c0_53 = arith.constant 0 : index
    %52 = vector.load %arg10[%c0_52, %c0_53] : memref<16x36xbf16, #tpu.memory_space<vmem>>, vector<16x36xbf16>
    %c0_54 = arith.constant 0 : index
    %c0_55 = arith.constant 0 : index
    %53 = vector.load %arg1[%c0_54, %c0_55] : memref<36x64xbf16, #tpu.memory_space<vmem>>, vector<36x64xbf16>
    %cst_56 = arith.constant dense<0.000000e+00> : vector<16x64xf32>
    %54 = tpu.matmul %52, %53, %cst_56 {dimension_numbers = #tpu.dot_dimension_numbers<[1], [0], [0], [1], [0, 0, 1, 1], [], []>} : vector<16x36xbf16>, vector<36x64xbf16>, vector<16x64xf32> -> vector<16x64xf32>
    %55 = arith.truncf %54 : vector<16x64xf32> to vector<16x64xbf16>
    %c0_57 = arith.constant 0 : index
    %c0_58 = arith.constant 0 : index
    %56 = vector.load %arg4[%c0_57, %c0_58] : memref<64x64xbf16, #tpu.memory_space<vmem>>, vector<64x64xbf16>
    %cst_59 = arith.constant dense<0.000000e+00> : vector<16x64xf32>
    %57 = tpu.matmul %55, %56, %cst_59 {dimension_numbers = #tpu.dot_dimension_numbers<[1], [0], [0], [1], [0, 0, 1, 1], [], []>} : vector<16x64xbf16>, vector<64x64xbf16>, vector<16x64xf32> -> vector<16x64xf32>
    %58 = arith.addf %51, %57 : vector<16x64xf32>
    %c0_60 = arith.constant 0 : index
    %c0_61 = arith.constant 0 : index
    %59 = vector.load %arg7[%c0_60, %c0_61] : memref<1x64xf32, #tpu.memory_space<vmem>>, vector<1x64xf32>
    %60 = vector.broadcast %59 : vector<1x64xf32> to vector<16x64xf32>
    %61 = arith.addf %58, %60 : vector<16x64xf32>
    %c0_62 = arith.constant 0 : index
    %c0_63 = arith.constant 0 : index
    %62 = vector.load %arg12[%c0_62, %c0_63] : memref<16x64xf32, #tpu.memory_space<vmem>>, vector<16x64xf32>
    tpu.vector_store %arg12[%c0_62, %c0_63], %61 {strides = array<i32>} : memref<16x64xf32, #tpu.memory_space<vmem>>, vector<16x64xf32>,
    return
  }
  func.func @transform_0(%arg0: i32) -> (i32, i32) {
    %c0_i32 = arith.constant 0 : i32
    %c0_i32_0 = arith.constant 0 : i32
    return %arg0, %c0_i32 : i32, i32
  }
  func.func @transform_1(%arg0: i32) -> (i32, i32, i32) {
    %c0_i32 = arith.constant 0 : i32
    %c0_i32_0 = arith.constant 0 : i32
    %c0_i32_1 = arith.constant 0 : i32
    %c0_i32_2 = arith.constant 0 : i32
    return %c0_i32, %c0_i32_0, %c0_i32_1 : i32, i32, i32
  }
  func.func @transform_2(%arg0: i32) -> (i32, i32, i32) {
    %c0_i32 = arith.constant 0 : i32
    %c0_i32_0 = arith.constant 0 : i32
    %c0_i32_1 = arith.constant 0 : i32
    %c0_i32_2 = arith.constant 0 : i32
    return %c0_i32, %c0_i32_0, %c0_i32_1 : i32, i32, i32
  }
  func.func @transform_3(%arg0: i32) -> (i32, i32) {
    %c0_i32 = arith.constant 0 : i32
    %c0_i32_0 = arith.constant 0 : i32
    %c0_i32_1 = arith.constant 0 : i32
    return %c0_i32, %c0_i32_0 : i32, i32
  }
  func.func @transform_4(%arg0: i32) -> (i32, i32) {
    %c0_i32 = arith.constant 0 : i32
    %c0_i32_0 = arith.constant 0 : i32
    %c0_i32_1 = arith.constant 0 : i32
    return %c0_i32, %c0_i32_0 : i32, i32
  }
  func.func @transform_5(%arg0: i32) -> (i32, i32) {
    %c0_i32 = arith.constant 0 : i32
    %c0_i32_0 = arith.constant 0 : i32
    %c0_i32_1 = arith.constant 0 : i32
    return %c0_i32, %c0_i32_0 : i32, i32
  }
  func.func @transform_6(%arg0: i32) -> (i32, i32) {
    %c0_i32 = arith.constant 0 : i32
    %c0_i32_0 = arith.constant 0 : i32
    %c0_i32_1 = arith.constant 0 : i32
    return %c0_i32, %c0_i32_0 : i32, i32
  }
  func.func @transform_7(%arg0: i32) -> (i32, i32) {
    %c0_i32 = arith.constant 0 : i32
    %c0_i32_0 = arith.constant 0 : i32
    %c0_i32_1 = arith.constant 0 : i32
    return %c0_i32, %c0_i32_0 : i32, i32
  }
  func.func @transform_8(%arg0: i32) -> (i32, i32) {
    %c0_i32 = arith.constant 0 : i32
    %c0_i32_0 = arith.constant 0 : i32
    %c0_i32_1 = arith.constant 0 : i32
    return %c0_i32, %c0_i32_0 : i32, i32
  }
  func.func @transform_9(%arg0: i32) -> (i32, i32) {
    %c0_i32 = arith.constant 0 : i32
    %c0_i32_0 = arith.constant 0 : i32
    %c0_i32_1 = arith.constant 0 : i32
    return %c0_i32, %c0_i32_0 : i32, i32
  }
  func.func @transform_10(%arg0: i32) -> (i32, i32) {
    %c0_i32 = arith.constant 0 : i32
    %c0_i32_0 = arith.constant 0 : i32
    %c0_i32_1 = arith.constant 0 : i32
    return %c0_i32, %c0_i32_0 : i32, i32
  }
  func.func @transform_11(%arg0: i32) -> (i32, i32) {
    %c0_i32 = arith.constant 0 : i32
    %c0_i32_0 = arith.constant 0 : i32
    return %arg0, %c0_i32 : i32, i32
  }
}

</mosaic_0001>

<bundles_post_ra>
// kernel: _lambda_.1
= control target key start
LH: loop header
LB: loop body
LE: loop exit
PB: predicated region body
PF: predicated region fallthrough
CT: control target
= control target key end

     0   :  { %v1793_v0 = vmov 0.0   ;;  %vm1794_vm0 = vmmov 0   ;;  %v1795_v4 = vmov 0   ;;  %vm75_vm1 = vsmask.f32 7424  ;;  %s2219_s1 = inlined_call_operand.vmem [shape: bf16[3,64,128], index: 1, kind: input, shape index: {}]   ;;  %s2220_s0 = inlined_call_operand.vmem [shape: bf16[36,64], index: 0, kind: input, shape index: {}]   ;;  %s2221_s7 = inlined_call_operand.vmem [shape: f32[34,1], index: 7, kind: input, shape index: {}]   ;;  %s2222_s2 = inlined_call_operand.vmem [shape: bf16[3,128,128], index: 2, kind: input, shape index: {}]   ;;  %s2223_s4 = inlined_call_operand.vmem [shape: f32[1,128], index: 4, kind: input, shape index: {}]   ;;  %s2224_s8 = inlined_call_operand.vmem [shape: bf16[16,34], index: 8, kind: input, shape index: {}]   ;;  %s2225_s9 = inlined_call_operand.vmem [shape: bf16[16,36], index: 9, kind: input, shape index: {}]   ;;  %s2226_s10 = inlined_call_operand.vmem [shape: bf16[128,64], index: 10, kind: input, shape index: {}]   ;;  %s2227_s5 = inlined_call_operand.vmem [shape: f32[1,128], index: 5, kind: input, shape index: {}]   ;;  %s2228_s3 = inlined_call_operand.vmem [shape: bf16[64,64], index: 3, kind: input, shape index: {}]   ;;  %s2229_s6 = inlined_call_operand.vmem [shape: f32[1,64], index: 6, kind: input, shape index: {}]   ;;  %s2230_s11 = inlined_call_operand.vmem [shape: f32[16,64], index: 11, kind: output, shape index: {}]  }
   0x1   :  { %1529 = vmatprep.subr.bf16.mxu0 %v1793_v0  ;;  %1549 = vmatprep.subr.bf16.mxu1 %v1793_v0  ;;  %v1730_v1 = vld [vmem:[%s2219_s1 + $0x38] sm:$0xff]   ;;  %v1732_v3 = vld [vmem:[%s2219_s1 + $0x30] sm:$0xff]   ;;  %v1734_v6 = vld [vmem:[%s2219_s1 + $0x28] sm:$0xff]   ;;  %vm123_vm2 = vcmask 523264   ;;  %vm292_vm3 = vcmask 1046528   ;;  %vm444_vm4 = vcmask 1040384  }
   0x2   :  { %v1731_v2 = vld [vmem:[%s2219_s1 + $0x18] sm:$0xff]   ;;  %1537 = vmatprep.mubr.msk.bf16.mxu0 %vm1794_vm0, %v1793_v0  ;;  %1557 = vmatprep.mubr.msk.bf16.mxu1 %vm1794_vm0, %v1793_v0  ;;  %v1733_v5 = vld [vmem:[%s2219_s1 + $0x10] sm:$0xff]   ;;  %v1735_v7 = vld [vmem:[%s2219_s1 + $0x8] sm:$0xff]   ;;  %vm445_vm5 = vsmask.f32 256  ;;  %vm450_vm7 = vcmask 1041409  }
   0x3   :  { %1530 = vmatpush3.bf16.msra.mxu0 %v1730_v1  ;;  %1728 = vset.pattern.permute.xlu0 %v1795_v4  ;;  %v39_v8 = vld [vmem:[%s2220_s0] sm:$0xf]  ;;  %v1890_v9 = vld [vmem:[%s2220_s0 + $0x4] sm:$0xf]  ;;  %v1896_v11 = vld [vmem:[%s2220_s0 + $0x8] sm:$0xff]   ;;  %vm522_vm10 = vcmask 1043456  }
   0x4   :  { %1550 = vmatpush3.bf16.msra.mxu1 %v1731_v2  ;;  %1531 = vmatprep.subr.bf16.mxu0 %v1793_v0  ;;  %v1325_v10 = vcombine.low %v39_v8, %v1890_v9  ;;  %v1736_v12 = vld [vmem:[%s2219_s1 + $0x20] sm:$0xff]   ;;  %v1904_v13 = vld [vmem:[%s2220_s0 + $0x10] ss:$0 sps:$4 sm:$0x33]   ;;  %v84_v17 = vshll.u32 %v1896_v11, 16  ;;  %v88_v20 = vshrl.u32 %v1896_v11, 16  ;;  %vm446_vm6 = vmand %vm444_vm4, %vm445_vm5 }
   0x5   :  { %1551 = vmatprep.subr.bf16.mxu1 %v1793_v0  ;;  %1729 = vset.pattern.permute.xlu1 %v1795_v4  ;;  %v1737_v14 = vld [vmem:[%s2219_s1] sm:$0xff]   ;;  %v92_v21 = vshll.u32 %v1904_v13, 16  ;;  %v1741_v23 = vld [vmem:[%s2219_s1 + $0x58] sm:$0xff]   ;;  %v411_v26 = vld [vmem:[%s2221_s7 + $0x10] sm:$0xff]  ;;  %v96_v35 = vshrl.u32 %v1904_v13, 16  ;;  %v294_v42 = vrot.slane %v1896_v11, 1 }
   0x6   :  { %v77_v15 = vshrl.u32 %v1325_v10, 16  ;;  %v79_v16 = vshll.u32 %v1325_v10, 16  ;;  %v86_v19 = vrot.slane %v84_v17, 1  ;;  %v409_v24 = vld [vmem:[%s2221_s7] sm:$0xff]  ;;  %v410_v27 = vld [vmem:[%s2221_s7 + $0x8] sm:$0xff]  ;;  %v1742_v30 = vld [vmem:[%s2219_s1 + $0x50] sm:$0xff]   ;;  %426 = vperm.xlu1 %1729, %v411_v26  }
   0x7   :  { %1532 = vmatpush3.bf16.msra.mxu0 %v1732_v3  ;;  %416 = vperm.xlu0 %1728, %v409_v24   ;;  %v94_v29 = vrot.slane %v92_v21, 1  ;;  %v412_v31 = vld [vmem:[%s2221_s7 + $0x18] sm:$0xff]  ;;  %v413_v32 = vld [vmem:[%s2221_s7 + $0x20] sm:$0x3]  ;;  %v1744_v34 = vld [vmem:[%s2219_s1 + $0x48] sm:$0xff]   ;;  %v296_v44 = vrot.slane %v1904_v13, 1 }
   0x8   :  { %1552 = vmatpush3.bf16.msra.mxu1 %v1733_v5  ;;  %1533 = vmatprep.subr.bf16.mxu0 %v1793_v0  ;;  %v81_v18 = vrot.slane %v79_v16, 1  ;;  %v90_v28 = vor.u32 %v88_v20, %v86_v19  ;;  %v1745_v36 = vld [vmem:[%s2219_s1 + $0x40] sm:$0xff]   ;;  %v1743_v39 = vld [vmem:[%s2220_s0 + $0x10] ss:$0 sps:$4 sm:$0x11]   ;;  %v1747_v46 = vld [vmem:[%s2222_s2 + $0x38] sm:$0xff]  }
   0x9   :  { %1553 = vmatprep.subr.bf16.mxu1 %v1793_v0  ;;  %v279_v37 = vld [vmem:[%s2220_s0] sm:$0xe]  ;;  %v98_v38 = vor.u32 %v96_v35, %v94_v29  ;;  %v297_v45 = vsel %vm292_vm3, %v294_v42, %v296_v44  ;;  %v447_v47 = vld [vmem:[#allocation2] sm:$0x1]  ;;  %v1748_v48 = vld [vmem:[%s2222_s2 + $0x30] sm:$0xff]   ;;  %vm531_vm15 = vcmask 1041408  }
   0xa   :  { %v82_v22 = vor.u32 %v81_v18, %v77_v15  ;;  %v95_v33 = vsel %vm75_vm1, %v90_v28, %v94_v29  ;;  %431 = vperm.xlu1 %1729, %v412_v31   ;;  %v1351_v40 = vcombine.low %v279_v37, %v1890_v9  ;;  %v448_v49 = vsel %vm446_vm6, 0, %v447_v47  ;;  %v1749_v50 = vld [vmem:[%s2222_s2 + $0x28] sm:$0xff]   ;;  %v1750_v51 = vld [vmem:[%s2222_s2 + $0x78] sm:$0xff]   ;;  %v1751_v52 = vld [vmem:[%s2222_s2 + $0x20] sm:$0xff]  }
   0xb   :  { %1534 = vmatpush3.bf16.msra.mxu0 %v1734_v6  ;;  %421 = vperm.xlu0 %1728, %v410_v27   ;;  %449 = vst [vmem:[#allocation2] sm:$0x1] %v448_v49  ;;  %v1752_v53 = vld [vmem:[%s2222_s2 + $0x70] sm:$0xff]   ;;  %v1753_v54 = vld [vmem:[%s2222_s2 + $0x18] sm:$0xff]   ;;  %v1754_v55 = vld [vmem:[%s2222_s2 + $0x68] sm:$0xff]  }
   0xc   :  { %1554 = vmatpush3.bf16.msra.mxu1 %v1735_v7  ;;  %1535 = vmatprep.subr.bf16.mxu0 %v1793_v0  ;;  %v87_v25 = vsel %vm75_vm1, %v82_v22, %v86_v19  ;;  %v293_v41 = vrot.slane %v1351_v40, 1  ;;  %v1755_v56 = vld [vmem:[%s2222_s2 + $0x10] sm:$0xff]   ;;  %v1756_v57 = vld [vmem:[%s2222_s2 + $0x60] sm:$0xff]   ;;  %vm451_vm8 = vsmask.f32 7942  ;;  %v1757_v58 = vld [vmem:[%s2222_s2 + $0x8] sm:$0xff]  }
   0xd   :  { %1555 = vmatprep.subr.bf16.mxu1 %v1793_v0  ;;  %vm452_vm9 = vmand %vm450_vm7, %vm451_vm8  ;;  %v453_v59 = vld [vmem:[#allocation2 + $0x10] sm:$0x2]  ;;  %v1758_v61 = vld [vmem:[%s2222_s2 + $0x58] sm:$0xff]   ;;  %vm523_vm11 = vsmask.f32 7938 }
   0xe   :  { %v295_v43 = vsel %vm292_vm3, %v293_v41, %v294_v42  ;;  %v454_v60 = vsel %vm452_vm9, 0, %v453_v59  ;;  %v1759_v62 = vld [vmem:[%s2222_s2] sm:$0xff]   ;;  %v1761_v63 = vld [vmem:[%s2222_s2 + $0x50] sm:$0xff]   ;;  %v1762_v1 = vld [vmem:[%s2222_s2 + $0x48] sm:$0xff]   ;;  %vm472_vm13 = vsmask.f32 4368 }
   0xf   :  { %1536 = vmatpush3.bf16.msra.mxu0 %v1736_v12  ;;  %436 = vperm.xlu0 %1728, %v413_v32   ;;  %455 = vst [vmem:[#allocation2 + $0x10] sm:$0x2] %v454_v60  ;;  %v1764_v2 = vld [vmem:[%s2222_s2 + $0x40] sm:$0xff]   ;;  %vm524_vm12 = vmand %vm522_vm10, %vm523_vm11 }
  0x10   :  { %1556 = vmatpush3.bf16.msra.mxu1 %v1737_v14  ;;  %1569 = vmatprep.subr.bf16.mxu0 %v1793_v0  ;;  %v1359_v29 = vld [vmem:[%s2223_s4] ss:$0 sm:$0xff]  ;;  %vm2060_vm14 = vmor %vm445_vm5, %vm472_vm13  ;;  %vm532_vm5 = vsmask.f32 1280 }
  0x11   :  { %1589 = vmatprep.subr.bf16.mxu1 %v1793_v0  ;;  %vm533_vm6 = vmand %vm531_vm15, %vm532_vm5 }
  0x12   :  { %1538 = vmatmul.mubr.msk.bf16.vlgmr.msra.gmra.mxu0 %vm123_vm2, %v87_v25  ;;  %v525_v59 = vld [vmem:[#allocation2] sm:$0xf] }
  0x13   :  { %1558 = vmatmul.mubr.msk.bf16.vlgmr.msra.gmra.mxu1 %vm123_vm2, %v1325_v10  ;;  %1541 = vmatprep.mubr.msk.bf16.mxu0 %vm1794_vm0, %v1793_v0 }
  0x14   :  { %1561 = vmatprep.mubr.msk.bf16.mxu1 %vm1794_vm0, %v1793_v0  ;;  %1570 = vmatpush3.bf16.msra.mxu0 %v1741_v23 }
  0x15   :  { %1571 = vmatprep.subr.bf16.mxu0 %v1793_v0  ;;  %1590 = vmatpush3.bf16.msra.mxu1 %v1750_v51 }
  0x16   :  { %1591 = vmatprep.subr.bf16.mxu1 %v1793_v0 }
  0x18   :  { %1572 = vmatpush3.bf16.msra.mxu0 %v1742_v30 }
  0x19   :  { %1573 = vmatprep.subr.bf16.mxu0 %v1793_v0  ;;  %1592 = vmatpush3.bf16.msra.mxu1 %v1752_v53 }
  0x1a   :  { %1542 = vmatmul.mubr.msk.bf16.gmra.mxu0 %vm123_vm2, %v95_v33  ;;  %1593 = vmatprep.subr.bf16.mxu1 %v1793_v0 }
  0x1b   :  { %1562 = vmatmul.mubr.msk.bf16.gmra.mxu1 %vm123_vm2, %v1896_v11  ;;  %1545 = vmatprep.mubr.msk.bf16.mxu0 %vm1794_vm0, %v1793_v0 }
  0x1c   :  { %1565 = vmatprep.mubr.msk.bf16.mxu1 %vm1794_vm0, %v1793_v0  ;;  %1574 = vmatpush3.bf16.msra.mxu0 %v1744_v34 }
  0x1d   :  { %1575 = vmatprep.subr.bf16.mxu0 %v1793_v0  ;;  %1594 = vmatpush3.bf16.msra.mxu1 %v1754_v55 }
  0x1e   :  { %1595 = vmatprep.subr.bf16.mxu1 %v1793_v0 }
  0x20   :  { %1576 = vmatpush3.bf16.msra.mxu0 %v1745_v36 }
  0x21   :  { %1617 = vmatprep.subr.bf16.mxu0 %v1793_v0  ;;  %1596 = vmatpush3.bf16.msra.mxu1 %v1756_v57 }
  0x22   :  { %1546 = vmatmul.mubr.msk.bf16.gmra.mxu0 %vm123_vm2, %v98_v38  ;;  %1597 = vmatprep.subr.bf16.mxu1 %v1793_v0 }
  0x23   :  { %1566 = vmatmul.mubr.msk.bf16.gmra.mxu1 %vm123_vm2, %v1743_v39  ;;  %1577 = vmatprep.mubr.msk.bf16.mxu0 %vm1794_vm0, %v1793_v0 }
  0x24   :  { %1605 = vmatprep.mubr.msk.bf16.mxu1 %vm1794_vm0, %v1793_v0 }
  0x25   :  { %1598 = vmatpush3.bf16.msra.mxu1 %v1758_v61 }
  0x26   :  { %1599 = vmatprep.subr.bf16.mxu1 %v1793_v0 }
  0x29   :  { %1600 = vmatpush3.bf16.msra.mxu1 %v1761_v63 }
  0x2a   :  { %1578 = vmatmul.mubr.msk.bf16.vlgmr.msra.gmra.mxu0 %vm123_vm2, %v295_v43  ;;  %1601 = vmatprep.subr.bf16.mxu1 %v1793_v0 }
  0x2b   :  { %1581 = vmatprep.mubr.msk.bf16.mxu0 %vm1794_vm0, %v1793_v0  ;;  %1618 = vmatpush3.bf16.msra.mxu0 %v1747_v46 }
  0x2c   :  { %1619 = vmatprep.subr.bf16.mxu0 %v1793_v0 }
  0x2d   :  { %1602 = vmatpush3.bf16.msra.mxu1 %v1762_v1 }
  0x2e   :  { %1603 = vmatprep.subr.bf16.mxu1 %v1793_v0 }
  0x2f   :  { %1620 = vmatpush3.bf16.msra.mxu0 %v1748_v48 }
  0x30   :  { %1621 = vmatprep.subr.bf16.mxu0 %v1793_v0 }
  0x31   :  { %1604 = vmatpush3.bf16.msra.mxu1 %v1764_v2 }
  0x32   :  { %1582 = vmatmul.mubr.msk.bf16.gmra.mxu0 %vm123_vm2, %v297_v45  ;;  %1645 = vmatprep.subr.bf16.mxu1 %v1793_v0 }
  0x33   :  { %1585 = vmatprep.mubr.msk.bf16.mxu0 %vm1794_vm0, %v1793_v0  ;;  %1622 = vmatpush3.bf16.msra.mxu0 %v1749_v50 }
  0x34   :  { %1623 = vmatprep.subr.bf16.mxu0 %v1793_v0 }
  0x37   :  { %1624 = vmatpush3.bf16.msra.mxu0 %v1751_v52 }
  0x38   :  { %1625 = vmatprep.subr.bf16.mxu0 %v1793_v0 }
  0x3a   :  { %1586 = vmatmul.mubr.msk.bf16.gmra.mxu0 %vm123_vm2, %v296_v44 }
  0x3b   :  { %1633 = vmatprep.mubr.msk.bf16.mxu0 %vm1794_vm0, %v1793_v0  ;;  %1626 = vmatpush3.bf16.msra.mxu0 %v1753_v54 }
  0x3c   :  { %1627 = vmatprep.subr.bf16.mxu0 %v1793_v0 }
  0x3f   :  { %1628 = vmatpush3.bf16.msra.mxu0 %v1755_v56 }
  0x40   :  { %1629 = vmatprep.subr.bf16.mxu0 %v1793_v0 }
  0x43   :  { %1630 = vmatpush3.bf16.msra.mxu0 %v1757_v58 }
  0x44   :  { %1631 = vmatprep.subr.bf16.mxu0 %v1793_v0 }
  0x47   :  { %1632 = vmatpush3.bf16.msra.mxu0 %v1759_v62 }
  0x48   :  { %1673 = vmatprep.subr.bf16.mxu0 %v1793_v0 }
  0x81   :  { %v427_v56 = vpop.permute.xlu1 %426 }
  0x82   :  { %v417_v34 = vpop.permute.xlu0 %416 }
  0x86   :  { %v422_v46 = vpop.permute.xlu0 %421 }
  0xd2   :  { %v167_v3 = vpop.f32.mrf.mxu0 }
  0xd3   :  { %v257_v4 = vpop.f32.mrf.mxu1 }
  0xd4   :  { %v1539_v5 = vpop.f32.mrf.mxu0  ;;  %v258_v27 = vadd.f32 %v257_v4, %v167_v3 }
  0xd5   :  { %v1559_v6 = vpop.f32.mrf.mxu1 }
  0xd6   :  { %v170_v7 = vpop.f32.mrf.mxu0 }
  0xd7   :  { %v260_v8 = vpop.f32.mrf.mxu1 }
  0xd8   :  { %v1540_v9 = vpop.f32.mrf.mxu0  ;;  %v261_v32 = vadd.f32 %v260_v8, %v170_v7  ;;  %v1773_v8 = vld [vmem:[%s2222_s2 + $0x88] sm:$0xff]  }
  0xd9   :  { %v1560_v10 = vpop.f32.mrf.mxu1 }
  0xda   :  { %v175_v11 = vpop.f32.mrf.mxu0 }
  0xdb   :  { %v265_v12 = vpop.f32.mrf.mxu1 }
  0xdc   :  { %v1543_v13 = vpop.f32.mrf.mxu0  ;;  %v266_v39 = vadd.f32 %v265_v12, %v175_v11 }
  0xdd   :  { %v1563_v14 = vpop.f32.mrf.mxu1 }
  0xde   :  { %v178_v15 = vpop.f32.mrf.mxu0  ;;  %v432_v14 = vpop.permute.xlu1 %431 }
  0xdf   :  { %v268_v16 = vpop.f32.mrf.mxu1 }
  0xe0   :  { %v1544_v17 = vpop.f32.mrf.mxu0  ;;  %v269_v48 = vadd.f32 %v268_v16, %v178_v15 }
  0xe1   :  { %v1564_v18 = vpop.f32.mrf.mxu1 }
  0xe2   :  { %v183_v19 = vpop.f32.mrf.mxu0 }
  0xe3   :  { %v273_v20 = vpop.f32.mrf.mxu1 }
  0xe4   :  { %v1547_v21 = vpop.f32.mrf.mxu0  ;;  %v274_v61 = vadd.f32 %v273_v20, %v183_v19 }
  0xe5   :  { %v1567_v22 = vpop.f32.mrf.mxu1 }
  0xe6   :  { %v186_v23 = vpop.f32.mrf.mxu0 }
  0xe7   :  { %v276_v24 = vpop.f32.mrf.mxu1  ;;  %v437_v23 = vpop.permute.xlu0 %436 }
  0xe8   :  { %v1548_v25 = vpop.f32.mrf.mxu0 }
  0xe9   :  { %v1568_v26 = vpop.f32.mrf.mxu1 }
  0xea   :  { %v365_v28 = vpop.f32.mrf.mxu0 }
  0xeb   :  { %v387_v30 = vadd.f32 %v365_v28, %v258_v27 }
  0xec   :  { %v1579_v31 = vpop.f32.mrf.mxu0 }
  0xed   :  { %v399_v33 = vadd.f32 %v1359_v29, %v387_v30 }
  0xee   :  { %v368_v35 = vpop.f32.mrf.mxu0 }
  0xef   :  { %v404_v36 = vmax.f32 %v399_v33, 0.0  ;;  %v388_v37 = vadd.f32 %v368_v35, %v261_v32 }
  0xf0   :  { %v1580_v38 = vpop.f32.mrf.mxu0 }
  0xf1   :  { %v439_v40 = vmul.f32 %v417_v34, %v404_v36  ;;  %v400_v41 = vadd.f32 %v1359_v29, %v388_v37 }
  0xf2   :  { %v373_v42 = vpop.f32.mrf.mxu0 }
  0xf3   :  { %v1448_v43 = vpack.c.bf16 %v439_v40, %v439_v40  ;;  %v405_v44 = vmax.f32 %v400_v41, 0.0  ;;  %v389_v45 = vadd.f32 %v373_v42, %v266_v39 }
  0xf4   :  { %v1583_v47 = vpop.f32.mrf.mxu0 }
  0xf5   :  { %v475_v49 = vshrl.u32 %v1448_v43, 16  ;;  %v440_v50 = vmul.f32 %v422_v46, %v405_v44  ;;  %v401_v51 = vadd.f32 %v1359_v29, %v389_v45  ;;  %v478_v52 = vshll.u32 %v1448_v43, 16  ;;  %v534_v45 = vld [vmem:[#allocation2 + $0x10] sm:$0x3] }
  0xf6   :  { %v376_v53 = vpop.f32.mrf.mxu0 }
  0xf7   :  { %v477_v54 = vrot.slane %v475_v49, 7  ;;  %v1449_v55 = vpack.c.bf16 %v440_v50, %v440_v50  ;;  %v406_v57 = vmax.f32 %v401_v51, 0.0  ;;  %v390_v58 = vadd.f32 %v376_v53, %v269_v48 }
  0xf8   :  { %v1584_v60 = vpop.f32.mrf.mxu0 }
  0xf9   :  { %v480_v62 = vor.u32 %v478_v52, %v477_v54  ;;  %v483_v63 = vshrl.u32 %v1449_v55, 16  ;;  %v441_v1 = vmul.f32 %v427_v56, %v406_v57  ;;  %v402_v2 = vadd.f32 %v1359_v29, %v390_v58  ;;  %v1767_v60 = vld [vmem:[%s2222_s2 + $0xb0] sm:$0xff]  }
  0xfa   :  { %v381_v3 = vpop.f32.mrf.mxu0  ;;  %v486_v6 = vshll.u32 %v1449_v55, 16  ;;  %v481_v12 = vrot.slane %v477_v54, 4  ;;  %v1765_v55 = vld [vmem:[%s2222_s2 + $0xb8] sm:$0xff]  }
  0xfb   :  { %v526_v4 = vsel %vm524_vm12, %v480_v62, %v525_v59  ;;  %v485_v5 = vrot.slane %v483_v63, 7  ;;  %v391_v7 = vadd.f32 %v381_v3, %v274_v61  ;;  %v1450_v9 = vpack.c.bf16 %v441_v1, %v441_v1  ;;  %v1769_v1 = vld [vmem:[%s2222_s2 + $0xa8] sm:$0xff]   ;;  %v1770_v3 = vld [vmem:[%s2222_s2 + $0xa0] sm:$0xff]  }
  0xfc   :  { %527 = vst [vmem:[#allocation2] sm:$0xf] %v526_v4  ;;  %v407_v10 = vmax.f32 %v402_v2, 0.0  ;;  %v1587_v11 = vpop.f32.mrf.mxu0 }
  0xfd   :  { %v488_v13 = vor.u32 %v486_v6, %v485_v5  ;;  %v403_v15 = vadd.f32 %v1359_v29, %v391_v7  ;;  %v492_v16 = vshrl.u32 %v1450_v9, 16  ;;  %v495_v22 = vshll.u32 %v1450_v9, 16  ;;  %v1772_v7 = vld [vmem:[%s2222_s2 + $0x90] sm:$0xff]  }
  0xfe   :  { %v442_v17 = vmul.f32 %v432_v14, %v407_v10  ;;  %v384_v18 = vpop.f32.mrf.mxu0  ;;  %v490_v27 = vrot.slane %v485_v5, 4  ;;  %v1771_v5 = vld [vmem:[%s2222_s2 + $0x98] sm:$0xff]   ;;  %v1774_v10 = vld [vmem:[%s2222_s2 + $0x80] sm:$0xff]  }
  0xff   :  { %v489_v19 = vsel %vm2060_vm14, %v481_v12, %v488_v13  ;;  %v408_v20 = vmax.f32 %v403_v15, 0.0  ;;  %v494_v21 = vrot.slane %v492_v16, 7  ;;  %v1782_v18 = vld [vmem:[%s2226_s10 + $0x30] sm:$0xff]  }
 0x100   :  { %528 = vst [vmem:[#allocation2 + $0x4] sm:$0xf] %v489_v19  ;;  %v1451_v24 = vpack.c.bf16 %v442_v17, %v442_v17  ;;  %v1588_v25 = vpop.f32.mrf.mxu0  ;;  %v1781_v17 = vld [vmem:[%s2226_s10 + $0x38] sm:$0xff]   ;;  %v1783_v19 = vld [vmem:[%s2226_s10 + $0x28] sm:$0xff]  }
 0x101   :  { %v443_v26 = vmul.f32 %v437_v23, %v408_v20  ;;  %v497_v28 = vor.u32 %v495_v22, %v494_v21  ;;  %v499_v35 = vrot.slane %v494_v21, 4  ;;  %v1784_v20 = vld [vmem:[%s2226_s10 + $0x20] sm:$0xff]   ;;  %v1785_v21 = vld [vmem:[%s2226_s10 + $0x18] sm:$0xff]   ;;  %v1786_v22 = vld [vmem:[%s2226_s10 + $0x10] sm:$0xff]  }
 0x102   :  { %v501_v30 = vshrl.u32 %v1451_v24, 16  ;;  %v504_v33 = vshll.u32 %v1451_v24, 16 }
 0x103   :  { %v1452_v31 = vpack.c.bf16 %v443_v26, %v443_v26  ;;  %v498_v29 = vsel %vm2060_vm14, %v490_v27, %v497_v28  ;;  %v537_v39 = vld [vmem:[#allocation2] sm:$0xf] }
 0x104   :  { %v503_v32 = vrot.slane %v501_v30, 7  ;;  %529 = vst [vmem:[#allocation2 + $0x8] sm:$0xf] %v498_v29  ;;  %v829_v9 = vld [vmem:[#allocation2] sm:$0xe] }
 0x105   :  { %v510_v34 = vshrl.u32 %v1452_v31, 16  ;;  %v513_v38 = vshll.u32 %v1452_v31, 16 }
 0x106   :  { %v506_v36 = vor.u32 %v504_v33, %v503_v32  ;;  %v508_v43 = vrot.slane %v503_v32, 4 }
 0x107   :  { %v512_v37 = vrot.slane %v510_v34, 7  ;;  %v2068_v40 = vld [vmem:[#allocation2 + $0x4] sm:$0xf] }
 0x108   :  { %v507_v41 = vsel %vm2060_vm14, %v499_v35, %v506_v36  ;;  %v1381_v42 = vcombine.low %v537_v39, %v2068_v40  ;;  %v1417_v11 = vcombine.low %v829_v9, %v2068_v40 }
 0x109   :  { %530 = vst [vmem:[#allocation2 + $0xc] sm:$0xf] %v507_v41  ;;  %v515_v44 = vor.u32 %v513_v38, %v512_v37 }
 0x10a   :  { %1634 = vmatmul.mubr.bf16.vlgmr.msra.gmra.mxu0 %v1381_v42  ;;  %v592_v48 = vshll.u32 %v1381_v42, 16  ;;  %v590_v51 = vshrl.u32 %v1381_v42, 16  ;;  %v850_v13 = vrot.slane %v1417_v11, 1 }
 0x10b   :  { %v516_v46 = vsel %vm2060_vm14, %v508_v43, %v515_v44  ;;  %1637 = vmatprep.mubr.msk.bf16.mxu0 %vm1794_vm0, %v1793_v0 }
 0x10c   :  { %v535_v47 = vsel %vm533_vm6, %v516_v46, %v534_v45  ;;  %v594_v50 = vrot.slane %v592_v48, 1 }
 0x10d   :  { %536 = vst [vmem:[#allocation2 + $0x10] sm:$0x3] %v535_v47 }
 0x10e   :  { %v595_v53 = vor.u32 %v594_v50, %v590_v51  ;;  %v1426_v50 = vld [vmem:[%s2227_s5] ss:$0 sm:$0xff] }
 0x110   :  { %v1763_v49 = vld [vmem:[#allocation2 + $0x8] sm:$0xff]  }
 0x111   :  { %v597_v52 = vshll.u32 %v1763_v49, 16  ;;  %v601_v61 = vshrl.u32 %v1763_v49, 16  ;;  %v851_v12 = vrot.slane %v1763_v49, 1 }
 0x112   :  { %1638 = vmatmul.mubr.bf16.gmra.mxu0 %v1763_v49 }
 0x113   :  { %1641 = vmatprep.mubr.msk.bf16.mxu0 %vm1794_vm0, %v1793_v0  ;;  %v599_v54 = vrot.slane %v597_v52, 1  ;;  %v852_v14 = vsel %vm292_vm3, %v850_v13, %v851_v12 }
 0x114   :  { %v1768_v56 = vld [vmem:[#allocation2 + $0x10] ss:$0 sps:$4 sm:$0x33]  }
 0x115   :  { %v600_v57 = vsel %vm75_vm1, %v595_v53, %v599_v54  ;;  %v605_v58 = vshll.u32 %v1768_v56, 16  ;;  %v1766_v59 = vld [vmem:[#allocation2 + $0x10] ss:$0 sps:$4 sm:$0x11]   ;;  %v603_v63 = vor.u32 %v601_v61, %v599_v54  ;;  %v609_v4 = vshrl.u32 %v1768_v56, 16 }
 0x116   :  { %1606 = vmatmul.mubr.bf16.vlgmr.msra.gmra.mxu1 %v600_v57  ;;  %v853_v15 = vrot.slane %v1768_v56, 1 }
 0x117   :  { %1646 = vmatpush3.bf16.msra.mxu1 %v1765_v55  ;;  %1609 = vmatprep.mubr.msk.bf16.mxu1 %vm1794_vm0, %v1793_v0  ;;  %v607_v62 = vrot.slane %v605_v58, 1 }
 0x118   :  { %1647 = vmatprep.subr.bf16.mxu1 %v1793_v0  ;;  %v854_v16 = vsel %vm292_vm3, %v851_v12, %v853_v15  ;;  %vm1087_vm3 = vcmask 293888  }
 0x119   :  { %v608_v2 = vsel %vm75_vm1, %v603_v63, %v607_v62  ;;  %v611_v6 = vor.u32 %v609_v4, %v607_v62  ;;  %vm994_vm1 = vcmask 277504  }
 0x11a   :  { %1642 = vmatmul.mubr.bf16.gmra.mxu0 %v1766_v59 }
 0x11b   :  { %1679 = vmatprep.mubr.msk.bf16.mxu0 %vm1794_vm0, %v1793_v0  ;;  %1648 = vmatpush3.bf16.msra.mxu1 %v1767_v60 }
 0x11c   :  { %1649 = vmatprep.subr.bf16.mxu1 %v1793_v0 }
 0x11e   :  { %1610 = vmatmul.mubr.bf16.gmra.mxu1 %v608_v2 }
 0x11f   :  { %1650 = vmatpush3.bf16.msra.mxu1 %v1769_v1  ;;  %1613 = vmatprep.mubr.msk.bf16.mxu1 %vm1794_vm0, %v1793_v0 }
 0x120   :  { %1651 = vmatprep.subr.bf16.mxu1 %v1793_v0 }
 0x123   :  { %1652 = vmatpush3.bf16.msra.mxu1 %v1770_v3 }
 0x124   :  { %1653 = vmatprep.subr.bf16.mxu1 %v1793_v0 }
 0x126   :  { %1614 = vmatmul.mubr.bf16.gmra.mxu1 %v611_v6 }
 0x127   :  { %1654 = vmatpush3.bf16.msra.mxu1 %v1771_v5  ;;  %1661 = vmatprep.mubr.msk.bf16.mxu1 %vm1794_vm0, %v1793_v0 }
 0x128   :  { %1655 = vmatprep.subr.bf16.mxu1 %v1793_v0 }
 0x12b   :  { %1656 = vmatpush3.bf16.msra.mxu1 %v1772_v7 }
 0x12c   :  { %1657 = vmatprep.subr.bf16.mxu1 %v1793_v0 }
 0x12f   :  { %1658 = vmatpush3.bf16.msra.mxu1 %v1773_v8 }
 0x130   :  { %1659 = vmatprep.subr.bf16.mxu1 %v1793_v0 }
 0x133   :  { %1660 = vmatpush3.bf16.msra.mxu1 %v1774_v10 }
 0x134   :  { %1705 = vmatprep.subr.bf16.mxu1 %v1793_v0 }
 0x136   :  { %1662 = vmatmul.mubr.bf16.vlgmr.msra.gmra.mxu1 %v852_v14 }
 0x137   :  { %1665 = vmatprep.mubr.msk.bf16.mxu1 %vm1794_vm0, %v1793_v0  ;;  %1706 = vmatpush3.bf16.msra.mxu1 %v1781_v17 }
 0x138   :  { %1707 = vmatprep.subr.bf16.mxu1 %v1793_v0 }
 0x13b   :  { %1708 = vmatpush3.bf16.msra.mxu1 %v1782_v18 }
 0x13c   :  { %1709 = vmatprep.subr.bf16.mxu1 %v1793_v0 }
 0x13e   :  { %1666 = vmatmul.mubr.bf16.gmra.mxu1 %v854_v16 }
 0x13f   :  { %1669 = vmatprep.mubr.msk.bf16.mxu1 %vm1794_vm0, %v1793_v0  ;;  %1710 = vmatpush3.bf16.msra.mxu1 %v1783_v19 }
 0x140   :  { %1711 = vmatprep.subr.bf16.mxu1 %v1793_v0 }
 0x143   :  { %1712 = vmatpush3.bf16.msra.mxu1 %v1784_v20 }
 0x144   :  { %1713 = vmatprep.subr.bf16.mxu1 %v1793_v0 }
 0x146   :  { %1670 = vmatmul.mubr.bf16.gmra.mxu1 %v853_v15 }
 0x147   :  { %1721 = vmatprep.mubr.msk.bf16.mxu1 %vm1794_vm0, %v1793_v0  ;;  %1714 = vmatpush3.bf16.msra.mxu1 %v1785_v21  ;;  %v1777_v21 = vld [vmem:[%s2220_s0 + $0x10] ss:$0 sps:$4 sm:$0x33]  }
 0x148   :  { %1715 = vmatprep.subr.bf16.mxu1 %v1793_v0 }
 0x14b   :  { %1716 = vmatpush3.bf16.msra.mxu1 %v1786_v22  ;;  %v1776_v22 = vld [vmem:[%s2224_s8] sm:$0xff]  }
 0x14c   :  { %1717 = vmatprep.subr.bf16.mxu1 %v1793_v0 }
 0x1ca   :  { %v807_v23 = vpop.f32.mrf.mxu0 }
 0x1cc   :  { %v1635_v24 = vpop.f32.mrf.mxu0 }
 0x1cd   :  { %v1778_v24 = vld [vmem:[%s2220_s0 + $0x8] sm:$0xff]  }
 0x1ce   :  { %v810_v25 = vpop.f32.mrf.mxu0 }
 0x1d0   :  { %v1636_v26 = vpop.f32.mrf.mxu0 }
 0x1d1   :  { %v1780_v26 = vld [vmem:[%s2225_s9] sm:$0xff]  }
 0x1d2   :  { %v815_v27 = vpop.f32.mrf.mxu0 }
 0x1d4   :  { %v1639_v28 = vpop.f32.mrf.mxu0 }
 0x1d5   :  { %v1788_v28 = vld [vmem:[%s2228_s3 + $0x18] sm:$0xff]  }
 0x1d6   :  { %v818_v30 = vpop.f32.mrf.mxu0  ;;  %v697_v31 = vpop.f32.mrf.mxu1 }
 0x1d7   :  { %v808_v47 = vadd.f32 %v807_v23, %v697_v31  ;;  %v1093_v23 = vsel %vm531_vm15, %v1777_v21, 0  ;;  %v1790_v31 = vld [vmem:[%s2228_s3 + $0x10] sm:$0xff]  }
 0x1d8   :  { %v1640_v29 = vpop.f32.mrf.mxu0  ;;  %v1607_v32 = vpop.f32.mrf.mxu1 }
 0x1d9   :  { %v1791_v29 = vld [vmem:[%s2228_s3 + $0x8] sm:$0xff]   ;;  %v1792_v32 = vld [vmem:[%s2228_s3] sm:$0xff]  }
 0x1da   :  { %v823_v33 = vpop.f32.mrf.mxu0  ;;  %v700_v34 = vpop.f32.mrf.mxu1 }
 0x1db   :  { %v811_v52 = vadd.f32 %v810_v25, %v700_v34  ;;  %v1779_v25 = vld [vmem:[%s2220_s0] sm:$0xff]  }
 0x1dc   :  { %v1643_v35 = vpop.f32.mrf.mxu0  ;;  %v1608_v36 = vpop.f32.mrf.mxu1 }
 0x1de   :  { %v826_v37 = vpop.f32.mrf.mxu0  ;;  %v705_v38 = vpop.f32.mrf.mxu1 }
 0x1df   :  { %v816_v4 = vadd.f32 %v815_v27, %v705_v38  ;;  %v1787_v27 = vld [vmem:[%s2226_s10 + $0x8] sm:$0xff]  }
 0x1e0   :  { %v1644_v39 = vpop.f32.mrf.mxu0  ;;  %v1611_v40 = vpop.f32.mrf.mxu1  ;;  %1718 = vmatpush3.bf16.msra.mxu1 %v1787_v27 }
 0x1e1   :  { %1719 = vmatprep.subr.bf16.mxu1 %v1793_v0 }
 0x1e2   :  { %v708_v41 = vpop.f32.mrf.mxu1 }
 0x1e3   :  { %v819_v1 = vadd.f32 %v818_v30, %v708_v41  ;;  %v1789_v30 = vld [vmem:[%s2226_s10] sm:$0xff]  }
 0x1e4   :  { %v1612_v42 = vpop.f32.mrf.mxu1  ;;  %1720 = vmatpush3.bf16.msra.mxu1 %v1789_v30 }
 0x1e6   :  { %v713_v43 = vpop.f32.mrf.mxu1 }
 0x1e7   :  { %v824_v3 = vadd.f32 %v823_v33, %v713_v43 }
 0x1e8   :  { %v1615_v44 = vpop.f32.mrf.mxu1 }
 0x1ea   :  { %v716_v45 = vpop.f32.mrf.mxu1 }
 0x1ec   :  { %v1616_v46 = vpop.f32.mrf.mxu1 }
 0x1f6   :  { %v940_v48 = vpop.f32.mrf.mxu1 }
 0x1f7   :  { %v962_v49 = vadd.f32 %v940_v48, %v808_v47  ;;  %v1447_v47 = vld [vmem:[%s2229_s6] ss:$0 sm:$0xff] }
 0x1f8   :  { %v1663_v51 = vpop.f32.mrf.mxu1 }
 0x1f9   :  { %v974_v54 = vadd.f32 %v1426_v50, %v962_v49 }
 0x1fa   :  { %v943_v53 = vpop.f32.mrf.mxu1 }
 0x1fb   :  { %v963_v55 = vadd.f32 %v943_v53, %v811_v52  ;;  %v979_v59 = vmax.f32 %v974_v54, 0.0 }
 0x1fc   :  { %v1664_v56 = vpop.f32.mrf.mxu1 }
 0x1fd   :  { %v975_v57 = vadd.f32 %v1426_v50, %v963_v55 }
 0x1fe   :  { %v948_v58 = vpop.f32.mrf.mxu1 }
 0x1ff   :  { %v980_v60 = vmax.f32 %v975_v57, 0.0  ;;  %v964_v8 = vadd.f32 %v948_v58, %v816_v4 }
 0x200   :  { %v1667_v61 = vpop.f32.mrf.mxu1 }
 0x201   :  { %v984_v62 = vpack.c.bf16 %v980_v60, %v979_v59  ;;  %v976_v14 = vadd.f32 %v1426_v50, %v964_v8 }
 0x202   :  { %v951_v63 = vpop.f32.mrf.mxu1 }
 0x203   :  { %v965_v5 = vadd.f32 %v951_v63, %v819_v1  ;;  %v981_v19 = vmax.f32 %v976_v14, 0.0 }
 0x204   :  { %v1668_v2 = vpop.f32.mrf.mxu1 }
 0x205   :  { %v977_v11 = vadd.f32 %v1426_v50, %v965_v5 }
 0x206   :  { %v956_v6 = vpop.f32.mrf.mxu1 }
 0x207   :  { %v966_v7 = vadd.f32 %v956_v6, %v824_v3  ;;  %v982_v17 = vmax.f32 %v977_v11, 0.0 }
 0x208   :  { %v1671_v9 = vpop.f32.mrf.mxu1 }
 0x209   :  { %v978_v10 = vadd.f32 %v1426_v50, %v966_v7  ;;  %v985_v20 = vpack.c.bf16 %v982_v17, %v981_v19 }
 0x20a   :  { %v959_v12 = vpop.f32.mrf.mxu1 }
 0x20b   :  { %v983_v13 = vmax.f32 %v978_v10, 0.0 }
 0x20c   :  { %v1672_v15 = vpop.f32.mrf.mxu1 }
 0x20d   :  { %v986_v16 = vpack.c.bf16 %v983_v13, %v983_v13 }
 0x20f   :  { %v1000_v18 = vsel %vm444_vm4, %v986_v16, 0 }
 0x210   :  { %1674 = vmatpush3.bf16.msra.mxu0 %v1000_v18 }
 0x211   :  { %1675 = vmatprep.subr.bf16.mxu0 %v1793_v0 }
 0x214   :  { %1676 = vmatpush3.bf16.msra.mxu0 %v985_v20 }
 0x215   :  { %1677 = vmatprep.subr.bf16.mxu0 %v1793_v0 }
 0x218   :  { %1678 = vmatpush3.bf16.msra.mxu0 %v984_v62 }
 0x219   :  { %1683 = vmatprep.subr.bf16.mxu0 %v1793_v0 }
 0x21b   :  { %1680 = vmatmul.mubr.msk.bf16.vlgmr.msra.gmra.mxu0 %vm994_vm1, %v1776_v22 }
 0x21c   :  { %1684 = vmatpush3.bf16.msra.mxu0 %v1093_v23  ;;  %1689 = vmatprep.mubr.msk.bf16.mxu0 %vm1794_vm0, %v1793_v0 }
 0x21d   :  { %1685 = vmatprep.subr.bf16.mxu0 %v1793_v0 }
 0x220   :  { %1686 = vmatpush3.bf16.msra.mxu0 %v1778_v24 }
 0x221   :  { %1687 = vmatprep.subr.bf16.mxu0 %v1793_v0 }
 0x224   :  { %1688 = vmatpush3.bf16.msra.mxu0 %v1779_v25 }
 0x225   :  { %1693 = vmatprep.subr.bf16.mxu0 %v1793_v0 }
 0x227   :  { %1690 = vmatmul.mubr.msk.bf16.vlgmr.msra.gmra.mxu0 %vm1087_vm3, %v1780_v26 }
 0x228   :  { %1701 = vmatprep.mubr.msk.bf16.mxu0 %vm1794_vm0, %v1793_v0  ;;  %1694 = vmatpush3.bf16.msra.mxu0 %v1788_v28 }
 0x229   :  { %1695 = vmatprep.subr.bf16.mxu0 %v1793_v0 }
 0x22c   :  { %1696 = vmatpush3.bf16.msra.mxu0 %v1790_v31 }
 0x22d   :  { %1697 = vmatprep.subr.bf16.mxu0 %v1793_v0 }
 0x230   :  { %1698 = vmatpush3.bf16.msra.mxu0 %v1791_v29 }
 0x231   :  { %1699 = vmatprep.subr.bf16.mxu0 %v1793_v0 }
 0x234   :  { %1700 = vmatpush3.bf16.msra.mxu0 %v1792_v32 }
 0x2db   :  { %v1036_v33 = vpop.f32.mrf.mxu0 }
 0x2dd   :  { %v1681_v34 = vpop.f32.mrf.mxu0 }
 0x2df   :  { %v1039_v35 = vpop.f32.mrf.mxu0 }
 0x2e0   :  { %v1043_v36 = vpack.c.bf16 %v1039_v35, %v1036_v33 }
 0x2e1   :  { %v1682_v37 = vpop.f32.mrf.mxu0 }
 0x2e2   :  { %1722 = vmatmul.mubr.bf16.vlgmr.msra.gmra.mxu1 %v1043_v36 }
 0x2e7   :  { %v1129_v38 = vpop.f32.mrf.mxu0 }
 0x2e9   :  { %v1691_v39 = vpop.f32.mrf.mxu0 }
 0x2eb   :  { %v1132_v40 = vpop.f32.mrf.mxu0 }
 0x2ec   :  { %v1136_v41 = vpack.c.bf16 %v1132_v40, %v1129_v38 }
 0x2ed   :  { %v1692_v42 = vpop.f32.mrf.mxu0 }
 0x2ee   :  { %1702 = vmatmul.mubr.msk.bf16.vlgmr.msra.gmra.mxu0 %vm123_vm2, %v1136_v41 }
 0x3a2   :  { %v1295_v43 = vpop.f32.mrf.mxu1 }
 0x3a4   :  { %v1723_v0 = vpop.f32.mrf.mxu1 }
 0x3a6   :  { %v1298_v44 = vpop.f32.mrf.mxu1 }
 0x3a8   :  { %v1724_v45 = vpop.f32.mrf.mxu1 }
 0x3ae   :  { %v1206_v46 = vpop.f32.mrf.mxu0 }
 0x3af   :  { %v1296_v48 = vadd.f32 %v1295_v43, %v1206_v46 }
 0x3b0   :  { %v1703_v49 = vpop.f32.mrf.mxu0 }
 0x3b1   :  { %v1309_v50 = vadd.f32 %v1447_v47, %v1296_v48 }
 0x3b2   :  { %v1209_v51 = vpop.f32.mrf.mxu0 }
 0x3b3   :  { %1311 = vst.msk [vmem:[%s2230_s11] sm:$0xff] %vm123_vm2, %v1309_v50  ;;  %v1299_v52 = vadd.f32 %v1298_v44, %v1209_v51 }
 0x3b4   :  { %v1704_v53 = vpop.f32.mrf.mxu0 }
 0x3b5   :  { %v1310_v54 = vadd.f32 %v1447_v47, %v1299_v52 }
 0x3b7   :  { %1312 = vst.msk [vmem:[%s2230_s11 + $0x8] sm:$0xff] %vm123_vm2, %v1310_v54 }

</bundles_post_ra>
